<compile_context>
chip_gen: v7x
topology: tpu7x:2x2x1
jax: 0.10.0
libtpu: 0.0.40
codegen_flags: <defaults>
</compile_context>

<pallas_src>
import functools

import jax
import jax.numpy as jnp
from jax.experimental import pallas as pl
from jax.experimental.pallas import tpu as pltpu


LANES = 128          # lane width: all layer outputs padded to this
MAX_TILE_M = 256     # batch tile for large M (multiple of 8 and of 128)


def _round_up(x, m):
    return (x + m - 1) // m * m


# ----------------------------------------------------------------------------
# Pallas kernel: fully fused decoder MLP over one batch tile.
#   x_ref : (TILE_M, K_in)              f32
#   w_ref : (sum_i K_pad_i, 128)        bf16  packed weight slab
#   b_ref : (num_layers, 128)           f32   packed (zero-padded) biases
#   o_ref : (TILE_M, 128)               f32   lane-dense padded output
# Matmuls hit the MXU (bf16 operands, f32 accumulation); bias add + ReLU run
# on the VPU in f32; intermediates never leave vregs/VMEM.
# ----------------------------------------------------------------------------
def _fused_mlp_kernel(x_ref, w_ref, b_ref, o_ref, *, layer_meta):
    h = x_ref[...]                                     # f32
    for li, (row_off, k_rows, act) in enumerate(layer_meta):
        w = w_ref[row_off:row_off + k_rows, :]         # static slice, bf16
        b = b_ref[li:li + 1, :]                        # (1, 128) f32 broadcast
        h = jnp.dot(h.astype(w.dtype), w,
                    preferred_element_type=jnp.float32) + b
        if act == "relu":
            h = jnp.maximum(h, 0.0)
    o_ref[...] = h.astype(o_ref.dtype)


def fused_decoder_mlp(x, packed):
    """Run the whole decoder MLP in a single Pallas kernel.

    x      : (M, K_in) f32 (already flattened)
    packed : dict with "w_slab" (rows,128) bf16, "b_slab" (L,128) f32,
             "layer_meta" static tuple, "n_out" logical output width.
    """
    w_slab = packed["w_slab"]
    b_slab = packed["b_slab"]
    layer_meta = packed["layer_meta"]
    n_out = packed["n_out"]

    M, K = x.shape
    # Sublane-full batch tile; cap at MAX_TILE_M and pad M to a multiple of it.
    tile_m = min(MAX_TILE_M, _round_up(max(M, 1), 8))
    m_pad = _round_up(M, tile_m)
    if m_pad != M:
        x = jnp.pad(x, ((0, m_pad - M), (0, 0)))
    grid = (m_pad // tile_m,)

    kernel = functools.partial(_fused_mlp_kernel, layer_meta=layer_meta)

    out_padded = pl.pallas_call(
        kernel,
        out_shape=jax.ShapeDtypeStruct((m_pad, LANES), x.dtype),
        grid=grid,
        in_specs=[
            pl.BlockSpec((tile_m, K), lambda i: (i, 0)),       # batch-tiled x
            pl.BlockSpec(w_slab.shape, lambda i: (0, 0)),      # resident params
            pl.BlockSpec(b_slab.shape, lambda i: (0, 0)),      # resident params
        ],
        out_specs=pl.BlockSpec((tile_m, LANES), lambda i: (i, 0)),
        compiler_params=pltpu.CompilerParams(
            dimension_semantics=("parallel",)),
    )(x, w_slab, b_slab)

    # Slice off batch padding and the lane padding of the last layer.
    return out_padded[:M, :n_out]


# ----------------------------------------------------------------------------
# Decoder: parameter construction, packing, forward
# ----------------------------------------------------------------------------
def init_decoder_params(key, in_features, layer_cfg):
    """layer_cfg: list of (out_features, act).  PyTorch-style uniform init."""
    params = []
    fan_in = in_features
    for out_features, act in layer_cfg:
        key, kw, kb = jax.random.split(key, 3)
        bound = 1.0 / jnp.sqrt(jnp.float32(fan_in))
        # weight stored already transposed: (in, out)
        w = jax.random.uniform(kw, (fan_in, out_features), jnp.float32,
                               minval=-bound, maxval=bound)
        b = jax.random.uniform(kb, (out_features,), jnp.float32,
                               minval=-bound, maxval=bound)
        params.append({"w": w, "b": b, "act": act})
        fan_in = out_features
    return params


def pack_decoder_params(params):
    """Pack per-layer (w, b) into one bf16 weight slab + one f32 bias slab.

    Every layer's output width is zero-padded to 128 lanes; layer i>0's input
    rows are padded to 128 to line up with the lane-padded activations, so the
    kernel can use static row-offset slices into one contiguous slab.
    """
    w_blocks, b_rows, layer_meta = [], [], []
    row_off = 0
    for i, layer in enumerate(params):
        w = layer["w"]                           # (k, n) logical f32
        k, n = w.shape
        k_pad = k if i == 0 else LANES           # x itself is not lane-padded
        assert k <= k_pad and n <= LANES
        w_pad = jnp.zeros((k_pad, LANES), jnp.float32).at[:k, :n].set(w)
        w_blocks.append(w_pad)
        b_rows.append(jnp.zeros((LANES,), jnp.float32).at[:n].set(layer["b"]))
        layer_meta.append((row_off, k_pad, layer["act"]))
        row_off += k_pad

    return {
        "w_slab": jnp.concatenate(w_blocks, axis=0).astype(jnp.bfloat16),
        "b_slab": jnp.stack(b_rows, axis=0),     # (L, 128) f32
        "layer_meta": tuple(layer_meta),
        "n_out": params[-1]["w"].shape[1],
    }


def decoder_forward(x, packed, is_linear=True):
    """Mirrors Decoder.forward: optional flatten, then run all layers fused.

    NOTE: the flatten assumes contiguous row-major NCHW so reshape(B, -1)
    matches torch .view.
    """
    if is_linear:
        x = x.reshape(x.shape[0], -1)
    return fused_decoder_mlp(x, packed)


def decoder_forward_ref(x, params, is_linear=True):
    """Pure-JAX reference (same bf16 operand rounding as the kernel)."""
    if is_linear:
        x = x.reshape(x.shape[0], -1)
    for layer in params:
        w = layer["w"].astype(jnp.bfloat16).astype(jnp.float32)
        h = x.astype(jnp.bfloat16).astype(jnp.float32)
        x = jnp.dot(h, w) + layer["b"]
        if layer["act"] == "relu":
            x = jnp.maximum(x, 0.0)
    return x


# TODO(synk): the non-linear (conv) branch of pars_model(cfg) is not specified
# by the reference module's cfg, so only the is_linear=True decoder is built.


if __name__ == "__main__":
    key = jax.random.PRNGKey(0)
    kx, kp = jax.random.split(key)

    # Small NCHW input consistent with the module: batch=2, channels=4, 4x4.
    x = jax.random.normal(kx, (2, 4, 4, 4), jnp.float32)

    in_features = 4 * 4 * 4  # 64 after flatten
    # Representative decoder cfg (widening then narrowing MLP).
    layer_cfg = [(64, "relu"), (32, "relu"), (16, None)]
    params = init_decoder_params(kp, in_features, layer_cfg)
    packed = pack_decoder_params(params)

    out = decoder_forward(x, packed, is_linear=True)
    out = jax.block_until_ready(out)

    ref = decoder_forward_ref(x, params, is_linear=True)
    assert out.shape == (2, 16), out.shape
    assert jnp.allclose(out, ref, atol=1e-4, rtol=1e-4), "mismatch vs reference"

    print("KERNEL_OK")
</pallas_src>

<mosaic_0001>
module attributes {stable_mosaic.version = 11 : i64} {
  func.func @_fused_mlp_kernel(%arg0: i32, %arg1: memref<8x64xf32, #tpu.memory_space<vmem>>, %arg2: memref<320x128xbf16, #tpu.memory_space<vmem>>, %arg3: memref<3x128xf32, #tpu.memory_space<vmem>>, %arg4: memref<8x128xf32, #tpu.memory_space<vmem>>) attributes {dimension_semantics = [#tpu.dimension_semantics<parallel>], iteration_bounds = array<i64: 1>, scalar_prefetch = 0 : i64, scratch_operands = 0 : i64, tpu.core_type = #tpu.core_type<tc>, window_params = [{transform_indices = @transform_0, window_bounds = array<i64: 8, 64>}, {pipeline_mode = #tpu.pipeline_mode<synchronous>, transform_indices = @transform_1, window_bounds = array<i64: 320, 128>}, {pipeline_mode = #tpu.pipeline_mode<synchronous>, transform_indices = @transform_2, window_bounds = array<i64: 3, 128>}, {transform_indices = @transform_3, window_bounds = array<i64: 8, 128>}]} {
    %c0 = arith.constant 0 : index
    %c0_0 = arith.constant 0 : index
    %0 = vector.load %arg1[%c0, %c0_0] : memref<8x64xf32, #tpu.memory_space<vmem>>, vector<8x64xf32>
    %c0_1 = arith.constant 0 : index
    %c0_2 = arith.constant 0 : index
    %1 = vector.load %arg2[%c0_1, %c0_2] : memref<320x128xbf16, #tpu.memory_space<vmem>>, vector<64x128xbf16>
    %c0_3 = arith.constant 0 : index
    %c0_4 = arith.constant 0 : index
    %2 = vector.load %arg3[%c0_3, %c0_4] : memref<3x128xf32, #tpu.memory_space<vmem>>, vector<1x128xf32>
    %3 = arith.truncf %0 : vector<8x64xf32> to vector<8x64xbf16>
    %cst = arith.constant dense<0.000000e+00> : vector<8x128xf32>
    %4 = tpu.matmul %3, %1, %cst {dimension_numbers = #tpu.dot_dimension_numbers<[1], [0], [0], [1], [0, 0, 1, 1], [], []>} : vector<8x64xbf16>, vector<64x128xbf16>, vector<8x128xf32> -> vector<8x128xf32>
    %5 = vector.broadcast %2 : vector<1x128xf32> to vector<8x128xf32>
    %6 = arith.addf %4, %5 : vector<8x128xf32>
    %cst_5 = arith.constant 0.000000e+00 : f32
    %7 = vector.broadcast %cst_5 : f32 to vector<8x128xf32>
    %8 = arith.maximumf %6, %7 : vector<8x128xf32>
    %c64 = arith.constant 64 : index
    %c0_6 = arith.constant 0 : index
    %9 = vector.load %arg2[%c64, %c0_6] : memref<320x128xbf16, #tpu.memory_space<vmem>>, vector<128x128xbf16>
    %c1 = arith.constant 1 : index
    %c0_7 = arith.constant 0 : index
    %10 = vector.load %arg3[%c1, %c0_7] : memref<3x128xf32, #tpu.memory_space<vmem>>, vector<1x128xf32>
    %11 = arith.truncf %8 : vector<8x128xf32> to vector<8x128xbf16>
    %cst_8 = arith.constant dense<0.000000e+00> : vector<8x128xf32>
    %12 = tpu.matmul %11, %9, %cst_8 {dimension_numbers = #tpu.dot_dimension_numbers<[1], [0], [0], [1], [0, 0, 1, 1], [], []>} : vector<8x128xbf16>, vector<128x128xbf16>, vector<8x128xf32> -> vector<8x128xf32>
    %13 = vector.broadcast %10 : vector<1x128xf32> to vector<8x128xf32>
    %14 = arith.addf %12, %13 : vector<8x128xf32>
    %cst_9 = arith.constant 0.000000e+00 : f32
    %15 = vector.broadcast %cst_9 : f32 to vector<8x128xf32>
    %16 = arith.maximumf %14, %15 : vector<8x128xf32>
    %c192 = arith.constant 192 : index
    %c0_10 = arith.constant 0 : index
    %17 = vector.load %arg2[%c192, %c0_10] : memref<320x128xbf16, #tpu.memory_space<vmem>>, vector<128x128xbf16>
    %c2 = arith.constant 2 : index
    %c0_11 = arith.constant 0 : index
    %18 = vector.load %arg3[%c2, %c0_11] : memref<3x128xf32, #tpu.memory_space<vmem>>, vector<1x128xf32>
    %19 = arith.truncf %16 : vector<8x128xf32> to vector<8x128xbf16>
    %cst_12 = arith.constant dense<0.000000e+00> : vector<8x128xf32>
    %20 = tpu.matmul %19, %17, %cst_12 {dimension_numbers = #tpu.dot_dimension_numbers<[1], [0], [0], [1], [0, 0, 1, 1], [], []>} : vector<8x128xbf16>, vector<128x128xbf16>, vector<8x128xf32> -> vector<8x128xf32>
    %21 = vector.broadcast %18 : vector<1x128xf32> to vector<8x128xf32>
    %22 = arith.addf %20, %21 : vector<8x128xf32>
    %c0_13 = arith.constant 0 : index
    %c0_14 = arith.constant 0 : index
    %23 = vector.load %arg4[%c0_13, %c0_14] : memref<8x128xf32, #tpu.memory_space<vmem>>, vector<8x128xf32>
    tpu.vector_store %arg4[%c0_13, %c0_14], %22 {strides = array<i32>} : memref<8x128xf32, #tpu.memory_space<vmem>>, vector<8x128xf32>,
    return
  }
  func.func @transform_0(%arg0: i32) -> (i32, i32) {
    %c0_i32 = arith.constant 0 : i32
    %c0_i32_0 = arith.constant 0 : i32
    return %arg0, %c0_i32 : i32, i32
  }
  func.func @transform_1(%arg0: i32) -> (i32, i32) {
    %c0_i32 = arith.constant 0 : i32
    %c0_i32_0 = arith.constant 0 : i32
    %c0_i32_1 = arith.constant 0 : i32
    return %c0_i32, %c0_i32_0 : i32, i32
  }
  func.func @transform_2(%arg0: i32) -> (i32, i32) {
    %c0_i32 = arith.constant 0 : i32
    %c0_i32_0 = arith.constant 0 : i32
    %c0_i32_1 = arith.constant 0 : i32
    return %c0_i32, %c0_i32_0 : i32, i32
  }
  func.func @transform_3(%arg0: i32) -> (i32, i32) {
    %c0_i32 = arith.constant 0 : i32
    %c0_i32_0 = arith.constant 0 : i32
    return %arg0, %c0_i32 : i32, i32
  }
}

</mosaic_0001>

<bundles_post_ra>
// kernel: tpu_custom_call.1
= control target key start
LH: loop header
LB: loop body
LE: loop exit
PB: predicated region body
PF: predicated region fallthrough
CT: control target
= control target key end

     0   :  { %8 = vsyncpa [#allocation3], 0  ;;  %s667_s0 = inlined_call_operand.hbm [shape: f32[8,64], index: 0, kind: input, shape index: {}]   ;;  %s668_s1 = inlined_call_operand.hbm [shape: bf16[320,128], index: 1, kind: input, shape index: {}]   ;;  %s669_s2 = inlined_call_operand.vmem [shape: f32[3,128], index: 2, kind: input, shape index: {}]   ;;  %s670_s3 = inlined_call_operand.hbm [shape: f32[8,128], index: 3, kind: output, shape index: {}]  }
   0x1   :  { %9 = vsyncpa [#allocation6], 0 }
   0x2   :  { %10 = vsyncpa [#allocation4], 0  ;;  %s562_s12 = smov [#allocation2]   ;;  %s563_s14 = smov [#allocation5]  }
   0x3   :  { %s17_s13 = sshll.u32 %s562_s12, 4  ;;  %s26_s15 = sshll.u32 %s563_s14, 4  ;;  %s18_s13 = int_to_ptr.vmem [resolvable:$true] %s17_s13  ;;  %s589_s15 = int_to_ptr.vmem [resolvable:$true] %s26_s15 }
   0x4   :  { %s490_s18 = scalar_lea.hbm %s667_s0, 128 }
   0x5   :  { %p491_p0 = scmp.ne.s32.totalorder %s667_s0, %s490_s18  ;;  %p494_p1 = scmp.lt.u32.totalorder %s490_s18, %s667_s0 }
   0x7   :  { %p496_p2 = pnand %p494_p1, %p491_p0 }
   0x9   :  { %499 = shalt.err (!%p496_p2)
}
   0xa   :  { %s500_s23 = scalar_lea.vmem %s18_s13, 128  ;;  %p505_p4 = scmp.lt.s32.totalorder %s18_s13, %s18_s13 }
   0xb   :  { %p501_p3 = scmp.ne.s32.totalorder %s18_s13, %s500_s23  ;;  %p506_p5 = scmp.lt.s32.totalorder %s500_s23, %s500_s23 }
   0xd   :  { %p507_p6 = por %p506_p5, %p505_p4 }
   0xf   :  { %p508_p7 = pnand %p507_p6, %p501_p3 }
  0x11   :  { %511 = shalt.err (!%p508_p7)
}
  0x12   :  { %20 = dma.hbm_to_vmem [thread:$0]  %s667_s0, 128, %s18_s13, [#allocation3]  }
  0x13   :  { %s512_s28 = scalar_lea.hbm %s668_s1, 2560 }
  0x14   :  { %p513_p8 = scmp.ne.s32.totalorder %s668_s1, %s512_s28  ;;  %p516_p9 = scmp.lt.u32.totalorder %s512_s28, %s668_s1 }
  0x16   :  { %p518_p10 = pnand %p516_p9, %p513_p8 }
  0x18   :  { %521 = shalt.err (!%p518_p10)
}
  0x19   :  { %s522_s6 = scalar_lea.vmem %s589_s15, 2560  ;;  %p527_p12 = scmp.lt.s32.totalorder %s589_s15, %s589_s15 }
  0x1a   :  { %p523_p11 = scmp.ne.s32.totalorder %s589_s15, %s522_s6  ;;  %p528_p13 = scmp.lt.s32.totalorder %s522_s6, %s522_s6 }
  0x1c   :  { %p529_p0 = por %p528_p13, %p527_p12 }
  0x1e   :  { %p530_p1 = pnand %p529_p0, %p523_p11 }
  0x20   :  { %533 = shalt.err (!%p530_p1)
}
  0x21   :  { %s564_s0 = smov 64   ;;  %s565_s7 = smov 4  }
  0x22   :  { %32 = dma.hbm_to_vmem [thread:$0]  %s668_s1, 2560, %s589_s15, [#allocation6], %s564_s0, %s564_s0, %s565_s7  }
  0x23   :  { %556 = dma.done.wait [#allocation3], 128  }
  0x24   :  { %557 = vsyncadd [#allocation3], 4294967168 }
  0x25   :  { %558 = dma.done.wait [#allocation6], 2560  }
  0x26   :  { %559 = vsyncadd [#allocation6], 4294964736  ;;  %v566_v0 = vmov 0.0   ;;  %vm567_vm0 = vmmov 0   ;;  %v470_v1 = vld [vmem:[#allocation5] sm:$0xff]   ;;  %v471_v2 = vld [vmem:[#allocation5 + $0x8] sm:$0xff]  }
  0x27   :  { %411 = vmatprep.subr.bf16.mxu0 %v566_v0  ;;  %419 = vmatprep.mubr.msk.bf16.mxu0 %vm567_vm0, %v566_v0  ;;  %v474_v3 = vld [vmem:[#allocation5 + $0x20] sm:$0xff]   ;;  %v472_v4 = vld [vmem:[#allocation5 + $0x10] sm:$0xff]   ;;  %v475_v5 = vld [vmem:[#allocation5 + $0x28] sm:$0xff]   ;;  %vm81_vm1 = vcmask 523264   ;;  %s568_s15 = smov [#allocation7]  }
  0x28   :  { %423 = vmatprep.subr.bf16.mxu1 %v566_v0  ;;  %439 = vmatprep.mubr.msk.bf16.mxu1 %vm567_vm0, %v566_v0  ;;  %v473_v6 = vld [vmem:[#allocation5 + $0x18] sm:$0xff]   ;;  %v476_v8 = vld [vmem:[#allocation5 + $0x30] sm:$0xff]   ;;  %v478_v11 = vld [vmem:[#allocation5 + $0x40] sm:$0xff]   ;;  %s354_s16 = sshll.u32 %s568_s15, 4  ;;  %s355_s16 = int_to_ptr.vmem [resolvable:$true] %s354_s16 }
  0x29   :  { %412 = vmatpush3.bf16.msra.mxu0 %v470_v1  ;;  %424 = vmatpush3.bf16.msra.mxu1 %v474_v3  ;;  %v42_v7 = vld [vmem:[#allocation2] sm:$0xff]  ;;  %v479_v12 = vld [vmem:[#allocation5 + $0x48] sm:$0xff]   ;;  %v480_v13 = vld [vmem:[#allocation5 + $0x50] sm:$0xff]   ;;  %s534_s17 = scalar_lea.vmem %s355_s16, 128  ;;  %p539_p3 = scmp.lt.s32.totalorder %s355_s16, %s355_s16 }
  0x2a   :  { %413 = vmatprep.subr.bf16.mxu0 %v566_v0  ;;  %425 = vmatprep.subr.bf16.mxu1 %v566_v0  ;;  %v52_v9 = vpack.c.bf16 %v42_v7, %v42_v7  ;;  %v477_v10 = vld [vmem:[#allocation5 + $0x38] sm:$0xff]   ;;  %v482_v15 = vld [vmem:[#allocation5 + $0x60] sm:$0xff]   ;;  %v483_v16 = vld [vmem:[#allocation5 + $0x68] sm:$0xff]   ;;  %p535_p2 = scmp.ne.s32.totalorder %s355_s16, %s534_s17  ;;  %p540_p4 = scmp.lt.s32.totalorder %s534_s17, %s534_s17 }
  0x2b   :  { %v481_v14 = vld [vmem:[#allocation5 + $0x58] sm:$0xff]   ;;  %v484_v17 = vld [vmem:[#allocation5 + $0x70] sm:$0xff]   ;;  %v486_v19 = vld [vmem:[#allocation5 + $0x80] sm:$0xff]  }
  0x2c   :  { %v485_v18 = vld [vmem:[#allocation5 + $0x78] sm:$0xff]   ;;  %v487_v20 = vld [vmem:[#allocation5 + $0x88] sm:$0xff]   ;;  %v488_v29 = vld [vmem:[#allocation5 + $0x90] sm:$0xff]   ;;  %p541_p5 = por %p540_p4, %p539_p3 }
  0x2d   :  { %414 = vmatpush3.bf16.msra.mxu0 %v471_v2  ;;  %426 = vmatpush3.bf16.msra.mxu1 %v475_v5  ;;  %v364_v21 = vld [vmem:[%s669_s2] ss:$0 sm:$0xff]  ;;  %v370_v31 = vld [vmem:[%s669_s2 + $0x1] ss:$0 sm:$0xff]  ;;  %v379_v39 = vld [vmem:[%s669_s2 + $0x2] ss:$0 sm:$0xff] }
  0x2e   :  { %415 = vmatprep.subr.bf16.mxu0 %v566_v0  ;;  %427 = vmatprep.subr.bf16.mxu1 %v566_v0  ;;  %v489_v30 = vld [vmem:[#allocation5 + $0x98] sm:$0xff]   ;;  %p542_p6 = pnand %p541_p5, %p535_p2 }
  0x31   :  { %416 = vmatpush3.bf16.msra.mxu0 %v472_v4  ;;  %428 = vmatpush3.bf16.msra.mxu1 %v476_v8 }
  0x32   :  { %417 = vmatprep.subr.bf16.mxu0 %v566_v0  ;;  %429 = vmatprep.subr.bf16.mxu1 %v566_v0 }
  0x35   :  { %418 = vmatpush3.bf16.msra.mxu0 %v473_v6  ;;  %430 = vmatpush3.bf16.msra.mxu1 %v477_v10 }
  0x36   :  { %443 = vmatprep.subr.bf16.mxu0 %v566_v0  ;;  %431 = vmatprep.subr.bf16.mxu1 %v566_v0 }
  0x38   :  { %420 = vmatmul.mubr.msk.bf16.vlgmr.msra.gmra.mrb[0].mxu0 %vm81_vm1, %v52_v9 }
  0x39   :  { %459 = vmatprep.mubr.msk.bf16.mxu0 %vm567_vm0, %v566_v0  ;;  %432 = vmatpush3.bf16.msra.mxu1 %v478_v11 }
  0x3a   :  { %433 = vmatprep.subr.bf16.mxu1 %v566_v0  ;;  %444 = vmatpush3.bf16.msra.mxu0 %v482_v15 }
  0x3b   :  { %445 = vmatprep.subr.bf16.mxu0 %v566_v0 }
  0x3d   :  { %434 = vmatpush3.bf16.msra.mxu1 %v479_v12 }
  0x3e   :  { %435 = vmatprep.subr.bf16.mxu1 %v566_v0  ;;  %446 = vmatpush3.bf16.msra.mxu0 %v483_v16 }
  0x3f   :  { %447 = vmatprep.subr.bf16.mxu0 %v566_v0 }
  0x41   :  { %436 = vmatpush3.bf16.msra.mxu1 %v480_v13 }
  0x42   :  { %437 = vmatprep.subr.bf16.mxu1 %v566_v0  ;;  %448 = vmatpush3.bf16.msra.mxu0 %v484_v17 }
  0x43   :  { %449 = vmatprep.subr.bf16.mxu0 %v566_v0 }
  0x45   :  { %438 = vmatpush3.bf16.msra.mxu1 %v481_v14 }
  0x46   :  { %450 = vmatpush3.bf16.msra.mxu0 %v485_v18 }
  0x47   :  { %451 = vmatprep.subr.bf16.mxu0 %v566_v0 }
  0x4a   :  { %452 = vmatpush3.bf16.msra.mxu0 %v486_v19 }
  0x4b   :  { %453 = vmatprep.subr.bf16.mxu0 %v566_v0 }
  0x4e   :  { %454 = vmatpush3.bf16.msra.mxu0 %v487_v20 }
  0x4f   :  { %455 = vmatprep.subr.bf16.mxu0 %v566_v0 }
  0x52   :  { %456 = vmatpush3.bf16.msra.mxu0 %v488_v29 }
  0x53   :  { %457 = vmatprep.subr.bf16.mxu0 %v566_v0 }
  0x56   :  { %458 = vmatpush3.bf16.msra.mxu0 %v489_v30 }
 0x10b   :  { %v119_v22 = vpop.f32.mrb[0].mxu0 }
 0x10c   :  { %v120_v23 = vadd.f32 %v364_v21, %v119_v22  ;;  %v421_v24 = vpop.f32.mrb[1].mxu0 }
 0x10d   :  { %v122_v25 = vpop.f32.mrb[2].mxu0 }
 0x10e   :  { %v125_v26 = vmax.f32 %v120_v23, 0.0  ;;  %v422_v27 = vpop.f32.mrb[3].mxu0 }
 0x110   :  { %v143_v28 = vpack.c.bf16 %v125_v26, %v125_v26 }
 0x112   :  { %440 = vmatmul.mubr.bf16.vlgmr.msra.gmra.mrb[0].mxu1 %v143_v28 }
 0x1e5   :  { %v230_v32 = vpop.f32.mrb[0].mxu1 }
 0x1e6   :  { %v231_v33 = vadd.f32 %v370_v31, %v230_v32  ;;  %v441_v34 = vpop.f32.mrb[1].mxu1 }
 0x1e7   :  { %v233_v35 = vpop.f32.mrb[2].mxu1 }
 0x1e8   :  { %v236_v36 = vmax.f32 %v231_v33, 0.0  ;;  %v442_v37 = vpop.f32.mrb[3].mxu1 }
 0x1ea   :  { %v254_v38 = vpack.c.bf16 %v236_v36, %v236_v36 }
 0x1ec   :  { %460 = vmatmul.mubr.bf16.vlgmr.msra.gmra.mrb[4].mxu0 %v254_v38 }
 0x2bf   :  { %v341_v40 = vpop.f32.mrb[4].mxu0 }
 0x2c0   :  { %v342_v41 = vadd.f32 %v379_v39, %v341_v40  ;;  %v461_v42 = vpop.f32.mrb[5].mxu0 }
 0x2c1   :  { %v344_v43 = vpop.f32.mrb[6].mxu0 }
 0x2c2   :  { %347 = vst [vmem:[#allocation7] sm:$0xff] %v342_v41  ;;  %v462_v44 = vpop.f32.mrb[7].mxu0 }
 0x2c3   :  { %545 = shalt.err (!%p542_p6)
}
 0x2c4   :  { %s546_s2 = scalar_lea.hbm %s670_s3, 128 }
 0x2c5   :  { %p547_p7 = scmp.ne.s32.totalorder %s670_s3, %s546_s2  ;;  %p550_p8 = scmp.lt.u32.totalorder %s546_s2, %s670_s3 }
 0x2c7   :  { %p552_p9 = pnand %p550_p8, %p547_p7 }
 0x2c9   :  { %555 = shalt.err (!%p552_p9)
}
 0x2ca   :  { %357 = dma.vmem_to_hbm [thread:$0]  %s355_s16, 128, %s670_s3, [#allocation4]  }
 0x2cb   :  { %560 = dma.done.wait [#allocation4], 128  }
 0x2cc   :  { %561 = vsyncadd [#allocation4], 4294967168 }
 0x2cd   :  { %361 = vsyncpa [#allocation3], 1 }
 0x2ce   :  { %362 = vsyncpa [#allocation6], 1 }
 0x2cf   :  { %363 = vsyncpa [#allocation4], 1 }

</bundles_post_ra>
